<compile_context>
chip_gen: v6e
topology: v6e:2x2x1
jax: 0.10.0
libtpu: 0.0.40
codegen_flags: <defaults>
</compile_context>

<pallas_src>
import functools

import jax
import jax.numpy as jnp
from jax.experimental import pallas as pl
from jax.experimental.pallas import tpu as pltpu


def _round_up(x: int, m: int) -> int:
    return ((x + m - 1) // m) * m


def _hbp_kernel(n_layers, hidden_size,
                x_ref, w0_ref, b0_ref, wf_ref, bf_ref,
                out_ref, h_ref):
    """One (batch-tile i, layer l) grid step.

    x_ref  : (TM, I)                input tile (block constant across l)
    w0_ref : (I, H),  b0_ref: (1, H)        input -> hidden projection
    wf_ref : (1, H, H + O_blk)      fused [W_h[l+1] | W_o_pad[l]] for layer l
    bf_ref : (1, 1, H + O_blk)      fused [b_h[l+1] | b_o_pad[l]]
    out_ref: (1, TM, O_blk)         lane-aligned output block for (l, i)
    h_ref  : (TM, H) f32 VMEM       hidden activation carried across the l axis
    """
    l = pl.program_id(1)

    # First layer of this batch tile: hidden state from the input projection.
    @pl.when(l == 0)
    def _():
        x = x_ref[...].astype(w0_ref.dtype)
        h_ref[...] = jax.nn.sigmoid(
            jnp.dot(x, w0_ref[...], preferred_element_type=jnp.float32)
            + b0_ref[...])

    # One fused MXU dot per layer: [pre-activation of h_{l+1} | out_l].
    h = h_ref[...].astype(wf_ref.dtype)
    fused = (jnp.dot(h, wf_ref[0], preferred_element_type=jnp.float32)
             + bf_ref[0])

    # Store this layer's lane-aligned O_blk-wide output block directly.
    out_ref[0] = fused[:, hidden_size:]

    # Next hidden state (skipped on the final layer; its W_h slot is zero).
    @pl.when(l < n_layers - 1)
    def _():
        h_ref[...] = jax.nn.sigmoid(fused[:, :hidden_size])


def hbp_forward(x, w0, b0, wh, bh, wo, bo, *, tm=None, mxu_dtype=None):
    """Returns (n_layers, batch, output_size) f32, matching torch.stack(outputs, 0)."""
    n_layers = wo.shape[0]
    batch, input_size = x.shape
    hidden_size = w0.shape[1]
    output_size = wo.shape[-1]

    # Lane-align the per-layer output block (multiple of 128) so per-layer
    # stores and writeback DMAs are unmasked, lane-dense vst.
    o_blk = _round_up(output_size, 128)
    pad_o = o_blk - output_size
    wo_p = jnp.pad(wo, ((0, 0), (0, 0), (0, pad_o)))          # (L, H, O_blk)
    bo_p = jnp.pad(bo, ((0, 0), (0, 0), (0, pad_o)))          # (L, 1, O_blk)

    # Fused per-layer RHS ordered [W_h[l+1] | W_o[l]] (split is lane-aligned
    # whenever hidden_size % 128 == 0). Final layer's W_h slot is zero.
    wh_ext = jnp.concatenate(
        [wh, jnp.zeros((1, hidden_size, hidden_size), wh.dtype)], axis=0)
    bh_ext = jnp.concatenate(
        [bh, jnp.zeros((1, 1, hidden_size), bh.dtype)], axis=0)
    w_fused = jnp.concatenate([wh_ext, wo_p], axis=-1)        # (L, H, H+O_blk)
    b_fused = jnp.concatenate([bh_ext, bo_p], axis=-1)        # (L, 1, H+O_blk)

    # Optional reduced-precision MXU operands; biases / activations stay f32.
    if mxu_dtype is not None:
        w0 = w0.astype(mxu_dtype)
        w_fused = w_fused.astype(mxu_dtype)
    b0 = b0.astype(jnp.float32)
    b_fused = b_fused.astype(jnp.float32)
    x = x.astype(jnp.float32)

    # Batch tile: large enough for the streaming roofline, but split into at
    # least two programs when batch allows so both v7x TensorCores get work.
    if tm is None:
        tm = min(batch, 512)
        if batch >= 16 and pl.cdiv(batch, tm) < 2:
            tm = _round_up(pl.cdiv(batch, 2), 8)
    grid = (pl.cdiv(batch, tm), n_layers)

    kernel = functools.partial(_hbp_kernel, n_layers, hidden_size)

    out = pl.pallas_call(
        kernel,
        out_shape=jax.ShapeDtypeStruct((n_layers, batch, o_blk), jnp.float32),
        grid=grid,
        in_specs=[
            pl.BlockSpec((tm, input_size), lambda i, l: (i, 0)),            # x
            pl.BlockSpec((input_size, hidden_size), lambda i, l: (0, 0)),   # W_h0
            pl.BlockSpec((1, hidden_size), lambda i, l: (0, 0)),            # b_h0
            pl.BlockSpec((1, hidden_size, hidden_size + o_blk),
                         lambda i, l: (l, 0, 0)),                           # fused W (streamed per layer)
            pl.BlockSpec((1, 1, hidden_size + o_blk),
                         lambda i, l: (l, 0, 0)),                           # fused b
        ],
        out_specs=pl.BlockSpec((1, tm, o_blk), lambda i, l: (l, i, 0)),
        scratch_shapes=[pltpu.VMEM((tm, hidden_size), jnp.float32)],        # carried h
        compiler_params=pltpu.CompilerParams(
            dimension_semantics=("parallel", "arbitrary"),
            vmem_limit_bytes=64 * 1024 * 1024),
    )(x, w0, b0, w_fused, b_fused)

    # Output is already laid out as (L, B, O_blk); drop the lane padding.
    return out[:, :, :output_size]


def init_params(key, input_size, hidden_size, output_size, n_layers):
    """Deterministic init mimicking torch.nn.Linear (uniform +/- 1/sqrt(fan_in))."""
    keys = jax.random.split(key, 6)

    def uniform(k, shape, fan_in):
        bound = 1.0 / jnp.sqrt(fan_in)
        return jax.random.uniform(k, shape, jnp.float32, -bound, bound)

    w0 = uniform(keys[0], (input_size, hidden_size), input_size)
    b0 = uniform(keys[1], (1, hidden_size), input_size)
    wh = uniform(keys[2], (max(n_layers - 1, 1), hidden_size, hidden_size),
                 hidden_size)[: n_layers - 1]
    bh = uniform(keys[3], (max(n_layers - 1, 1), 1, hidden_size),
                 hidden_size)[: n_layers - 1]
    wo = uniform(keys[4], (n_layers, hidden_size, output_size), hidden_size)
    bo = uniform(keys[5], (n_layers, 1, output_size), hidden_size)
    return w0, b0, wh, bh, wo, bo


def hbp_reference(x, w0, b0, wh, bh, wo, bo):
    """Pure-JAX reference for correctness checking."""
    n_layers = wo.shape[0]
    h = jax.nn.sigmoid(x @ w0 + b0)
    outs = [h @ wo[0] + bo[0]]
    for i in range(1, n_layers):
        h = jax.nn.sigmoid(h @ wh[i - 1] + bh[i - 1])
        outs.append(h @ wo[i] + bo[i])
    return jnp.stack(outs, axis=0)


if __name__ == "__main__":
    batch = 8
    input_size = 16
    hidden_size = 32
    output_size = 8
    n_hidden_layers = 3

    key = jax.random.PRNGKey(0)
    k_x, k_p = jax.random.split(key)

    x = jax.random.normal(k_x, (batch, input_size), dtype=jnp.float32)
    params = init_params(k_p, input_size, hidden_size, output_size,
                         n_hidden_layers)
    ref = hbp_reference(x, *params)

    # f32 MXU-operand path (exact).
    out = jax.block_until_ready(hbp_forward(x, *params))
    assert out.shape == (n_hidden_layers, batch, output_size)
    assert jnp.allclose(out, ref, atol=1e-4, rtol=1e-4), (
        float(jnp.max(jnp.abs(out - ref))))

    # bf16 MXU-operand path (f32 accumulation / bias / sigmoid).
    out_bf = jax.block_until_ready(
        hbp_forward(x, *params, mxu_dtype=jnp.bfloat16))
    assert jnp.allclose(out_bf, ref, atol=5e-2, rtol=5e-2), (
        float(jnp.max(jnp.abs(out_bf - ref))))

    # Single-layer variant (exercises the uniform fused path, no placeholders).
    params1 = init_params(k_p, input_size, hidden_size, output_size, 1)
    ref1 = hbp_reference(x, *params1)
    out1 = jax.block_until_ready(hbp_forward(x, *params1))
    assert out1.shape == (1, batch, output_size)
    assert jnp.allclose(out1, ref1, atol=1e-4, rtol=1e-4), (
        float(jnp.max(jnp.abs(out1 - ref1))))

    print("KERNEL_OK")
</pallas_src>

<mosaic_0001>
module attributes {stable_mosaic.version = 11 : i64} {
  func.func @_hbp_kernel(%arg0: i32, %arg1: i32, %arg2: memref<8x16xf32, #tpu.memory_space<vmem>>, %arg3: memref<16x32xf32, #tpu.memory_space<vmem>>, %arg4: memref<1x32xf32, #tpu.memory_space<vmem>>, %arg5: memref<1x32x160xf32, #tpu.memory_space<vmem>>, %arg6: memref<1x1x160xf32, #tpu.memory_space<vmem>>, %arg7: memref<1x8x128xf32, #tpu.memory_space<vmem>>, %arg8: memref<8x32xf32, #tpu.memory_space<vmem>>) attributes {dimension_semantics = [#tpu.dimension_semantics<parallel>, #tpu.dimension_semantics<arbitrary>], iteration_bounds = array<i64: 1, 3>, scalar_prefetch = 0 : i64, scratch_operands = 1 : i64, tpu.core_type = #tpu.core_type<tc>, window_params = [{transform_indices = @transform_0, window_bounds = array<i64: 8, 16>}, {pipeline_mode = #tpu.pipeline_mode<synchronous>, transform_indices = @transform_1, window_bounds = array<i64: 16, 32>}, {pipeline_mode = #tpu.pipeline_mode<synchronous>, transform_indices = @transform_2, window_bounds = array<i64: 1, 32>}, {transform_indices = @transform_3, window_bounds = array<i64: 1, 32, 160>}, {transform_indices = @transform_4, window_bounds = array<i64: 1, 1, 160>}, {transform_indices = @transform_5, window_bounds = array<i64: 1, 8, 128>}]} {
    %c0_i32 = arith.constant 0 : i32
    %0 = arith.cmpi eq, %arg1, %c0_i32 : i32
    %1 = arith.extui %0 : i1 to i32
    %c0_i32_0 = arith.constant 0 : i32
    %2 = arith.cmpi ne, %1, %c0_i32_0 : i32
    scf.if %2 {
      %c0_12 = arith.constant 0 : index
      %c0_13 = arith.constant 0 : index
      %18 = vector.load %arg2[%c0_12, %c0_13] : memref<8x16xf32, #tpu.memory_space<vmem>>, vector<8x16xf32>
      %c0_14 = arith.constant 0 : index
      %c0_15 = arith.constant 0 : index
      %19 = vector.load %arg3[%c0_14, %c0_15] : memref<16x32xf32, #tpu.memory_space<vmem>>, vector<16x32xf32>
      %cst_16 = arith.constant dense<0.000000e+00> : vector<8x32xf32>
      %20 = tpu.matmul %18, %19, %cst_16 {dimension_numbers = #tpu.dot_dimension_numbers<[1], [0], [0], [1], [0, 0, 1, 1], [], []>} : vector<8x16xf32>, vector<16x32xf32>, vector<8x32xf32> -> vector<8x32xf32>
      %c0_17 = arith.constant 0 : index
      %c0_18 = arith.constant 0 : index
      %21 = vector.load %arg4[%c0_17, %c0_18] : memref<1x32xf32, #tpu.memory_space<vmem>>, vector<1x32xf32>
      %22 = vector.broadcast %21 : vector<1x32xf32> to vector<8x32xf32>
      %23 = arith.addf %20, %22 : vector<8x32xf32>
      %24 = arith.negf %23 : vector<8x32xf32>
      %25 = math.exp %24 : vector<8x32xf32>
      %cst_19 = arith.constant 1.000000e+00 : f32
      %26 = vector.broadcast %cst_19 : f32 to vector<8x32xf32>
      %27 = arith.addf %26, %25 : vector<8x32xf32>
      %28 = arith.divf %26, %27 : vector<8x32xf32>
      %c0_20 = arith.constant 0 : index
      %c0_21 = arith.constant 0 : index
      %29 = vector.load %arg8[%c0_20, %c0_21] : memref<8x32xf32, #tpu.memory_space<vmem>>, vector<8x32xf32>
      tpu.vector_store %arg8[%c0_20, %c0_21], %28 {strides = array<i32>} : memref<8x32xf32, #tpu.memory_space<vmem>>, vector<8x32xf32>,
    } else {
    }
    %c0 = arith.constant 0 : index
    %c0_1 = arith.constant 0 : index
    %3 = vector.load %arg8[%c0, %c0_1] : memref<8x32xf32, #tpu.memory_space<vmem>>, vector<8x32xf32>
    %c0_2 = arith.constant 0 : index
    %c0_3 = arith.constant 0 : index
    %c0_4 = arith.constant 0 : index
    %4 = vector.load %arg5[%c0_2, %c0_3, %c0_4] : memref<1x32x160xf32, #tpu.memory_space<vmem>>, vector<1x32x160xf32>
    %5 = vector.shape_cast %4 : vector<1x32x160xf32> to vector<32x160xf32>
    %cst = arith.constant dense<0.000000e+00> : vector<8x160xf32>
    %6 = tpu.matmul %3, %5, %cst {dimension_numbers = #tpu.dot_dimension_numbers<[1], [0], [0], [1], [0, 0, 1, 1], [], []>} : vector<8x32xf32>, vector<32x160xf32>, vector<8x160xf32> -> vector<8x160xf32>
    %c0_5 = arith.constant 0 : index
    %c0_6 = arith.constant 0 : index
    %c0_7 = arith.constant 0 : index
    %7 = vector.load %arg6[%c0_5, %c0_6, %c0_7] : memref<1x1x160xf32, #tpu.memory_space<vmem>>, vector<1x1x160xf32>
    %8 = vector.shape_cast %7 : vector<1x1x160xf32> to vector<1x160xf32>
    %9 = vector.broadcast %8 : vector<1x160xf32> to vector<8x160xf32>
    %10 = arith.addf %6, %9 : vector<8x160xf32>
    %11 = vector.extract_strided_slice %10 {offsets = [0, 32], sizes = [8, 128], strides = [1, 1]} : vector<8x160xf32> to vector<8x128xf32>
    %c0_8 = arith.constant 0 : index
    %c0_9 = arith.constant 0 : index
    %c0_10 = arith.constant 0 : index
    %12 = vector.load %arg7[%c0_8, %c0_9, %c0_10] : memref<1x8x128xf32, #tpu.memory_space<vmem>>, vector<1x8x128xf32>
    %13 = vector.shape_cast %12 : vector<1x8x128xf32> to vector<8x128xf32>
    %14 = vector.shape_cast %11 : vector<8x128xf32> to vector<1x8x128xf32>
    tpu.vector_store %arg7[%c0_8, %c0_9, %c0_10], %14 {strides = array<i32>} : memref<1x8x128xf32, #tpu.memory_space<vmem>>, vector<1x8x128xf32>,
    %c2_i32 = arith.constant 2 : i32
    %15 = arith.cmpi slt, %arg1, %c2_i32 : i32
    %16 = arith.extui %15 : i1 to i32
    %c0_i32_11 = arith.constant 0 : i32
    %17 = arith.cmpi ne, %16, %c0_i32_11 : i32
    scf.if %17 {
      %18 = vector.extract_strided_slice %10 {offsets = [0, 0], sizes = [8, 32], strides = [1, 1]} : vector<8x160xf32> to vector<8x32xf32>
      %19 = arith.negf %18 : vector<8x32xf32>
      %20 = math.exp %19 : vector<8x32xf32>
      %cst_12 = arith.constant 1.000000e+00 : f32
      %21 = vector.broadcast %cst_12 : f32 to vector<8x32xf32>
      %22 = arith.addf %21, %20 : vector<8x32xf32>
      %23 = arith.divf %21, %22 : vector<8x32xf32>
      %c0_13 = arith.constant 0 : index
      %c0_14 = arith.constant 0 : index
      %24 = vector.load %arg8[%c0_13, %c0_14] : memref<8x32xf32, #tpu.memory_space<vmem>>, vector<8x32xf32>
      tpu.vector_store %arg8[%c0_13, %c0_14], %23 {strides = array<i32>} : memref<8x32xf32, #tpu.memory_space<vmem>>, vector<8x32xf32>,
    } else {
    }
    return
  }
  func.func @transform_0(%arg0: i32, %arg1: i32) -> (i32, i32) {
    %c0_i32 = arith.constant 0 : i32
    %c0_i32_0 = arith.constant 0 : i32
    return %arg0, %c0_i32 : i32, i32
  }
  func.func @transform_1(%arg0: i32, %arg1: i32) -> (i32, i32) {
    %c0_i32 = arith.constant 0 : i32
    %c0_i32_0 = arith.constant 0 : i32
    %c0_i32_1 = arith.constant 0 : i32
    return %c0_i32, %c0_i32_0 : i32, i32
  }
  func.func @transform_2(%arg0: i32, %arg1: i32) -> (i32, i32) {
    %c0_i32 = arith.constant 0 : i32
    %c0_i32_0 = arith.constant 0 : i32
    %c0_i32_1 = arith.constant 0 : i32
    return %c0_i32, %c0_i32_0 : i32, i32
  }
  func.func @transform_3(%arg0: i32, %arg1: i32) -> (i32, i32, i32) {
    %c0_i32 = arith.constant 0 : i32
    %c0_i32_0 = arith.constant 0 : i32
    %c0_i32_1 = arith.constant 0 : i32
    return %arg1, %c0_i32, %c0_i32_0 : i32, i32, i32
  }
  func.func @transform_4(%arg0: i32, %arg1: i32) -> (i32, i32, i32) {
    %c0_i32 = arith.constant 0 : i32
    %c0_i32_0 = arith.constant 0 : i32
    %c0_i32_1 = arith.constant 0 : i32
    return %arg1, %c0_i32, %c0_i32_0 : i32, i32, i32
  }
  func.func @transform_5(%arg0: i32, %arg1: i32) -> (i32, i32, i32) {
    %c0_i32 = arith.constant 0 : i32
    %c0_i32_0 = arith.constant 0 : i32
    return %arg1, %arg0, %c0_i32 : i32, i32, i32
  }
}

</mosaic_0001>

<bundles_post_ra>
// kernel: tpu_custom_call.1
= control target key start
LH: loop header
LB: loop body
LE: loop exit
PB: predicated region body
PF: predicated region fallthrough
CT: control target
= control target key end

     0   :  { %s1201_s0 = inlined_call_operand.hbm [shape: f32[8,16], index: 0, kind: input, shape index: {}]   ;;  %s1202_s1 = inlined_call_operand.hbm [shape: f32[16,32], index: 1, kind: input, shape index: {}]   ;;  %s1203_s2 = inlined_call_operand.vmem [shape: f32[1,32], index: 2, kind: input, shape index: {}]   ;;  %s1204_s3 = inlined_call_operand.hbm [shape: f32[3,32,160], index: 3, kind: input, shape index: {}]   ;;  %s1205_s4 = inlined_call_operand.vmem [shape: f32[3,1,160], index: 4, kind: input, shape index: {}]   ;;  %s1206_s5 = inlined_call_operand.hbm [shape: f32[3,8,128], index: 5, kind: output, shape index: {}]  }
   0x1   :  { %1214 = sst [smem:[#allocation16_spill]] %s1201_s0 }
   0x2   :  { %10 = vsyncpa [#allocation4], 0 }
   0x3   :  { %11 = vsyncpa [#allocation7], 0 }
   0x4   :  { %12 = vsyncpa [#allocation5], 0 }
   0x5   :  { %14 = vsyncpa [#allocation5 + $0x1], 0  ;;  %s994_s18 = smov 0   ;;  %s996_s19 = smov 0  }
   0x6   :  { %s998_s20 = smov 0   ;;  %s1000_s21 = smov 0  }
   0x7   :  { %s1002_s22 = smov 0   ;;  %s1004_s23 = smov 0  }
   0x8 LB: > { %1215 = sst [smem:[#allocation14_spill]] %s930_s18  ;;  %s1025_s24 = sadd.s32 4294967295, %s950_s23   ;;  %s950_s23 = sphi %s1004_s23, %s20_s23   ;;  %s946_s22 = sphi %s1002_s22, %s1241_s22   ;;  %s942_s21 = sphi %s1000_s21, %s1240_s21   ;;  %s938_s20 = sphi %s998_s20, %s1239_s20   ;;  %s934_s19 = sphi %s996_s19, %s1238_s19   ;;  %s930_s18 = sphi %s994_s18, %s1237_s18  }
   0x9   : > { %s647_s25 = sadd.s32 4294967294, %s950_s23   ;;  %p114_p0 = scmp.ne.s32.totalorder %s938_s20, %s934_s19 }
   0xa   : > { %p115_p1 = scmp.eq.s32.totalorder %s950_s23, 0  ;;  %p120_p2 = scmp.ne.s32.totalorder %s934_s19, %s930_s18 }
   0xb   : > { %p1208_p3 = scmp.eq.s32.totalorder %s1025_s24, 0  ;;  %p172_p4 = scmp.eq.s32.totalorder %s1025_s24, 2 }
   0xc   : > { %p1036_p5 = por %p115_p1, %p114_p0  ;;  %p178_p6 = scmp.eq.s32.totalorder %s647_s25, 2 }
   0xd   : > { %p1042_p7 = por %p1208_p3, %p120_p2  ;;  %p1046_p8 = por %p172_p4, %p114_p0 }
   0xe   : > { %p1050_p9 = por %p178_p6, %p120_p2  ;;  %p648_p10 = scmp.ge.s32.totalorder %s950_s23, 1 }
   0xf   : > { %s1217_s28 = scalar_select %p1042_p7, 1, 0 }
  0x10   : > { %s1218_s29 = scalar_select %p1046_p8, 1, 0 }
  0x11   : > { %s1219_s30 = scalar_select %p1050_p9, 1, 0 }
  0x12   : > { %p185_p11 = scmp.lt.s32.totalorder %s950_s23, 4  ;;  %s952_s7 = smov [#allocation3]  }
  0x13   : > { %1220 = sst [smem:[#allocation15_spill]] %s1219_s30  ;;  %s200_s8 = sshll.u32 %s952_s7, 4  ;;  %s201_s8 = int_to_ptr.vmem [resolvable:$true] %s200_s8 }
  0x14   : > { %p1056_p12 = pnand %p648_p10, %p185_p11  ;;  %p712_p13 = scmp.lt.s32.totalorder %s950_s23, 3 }
  0x15   : > { %s953_s10 = smov [#allocation6]   ;;  %s793_s13 = scalar_lea.vmem %s201_s8, 128 }
  0x16   : > { %s1221_s6 = scalar_select %p1056_p12, 1, 0 }
  0x17   : > { %p695_p0 = pneg %p1056_p12  ;;  %p1065_p1 = pnand %p712_p13, %p1036_p5 }
  0x18   : > { %s210_s11 = sshll.u32 %s953_s10, 4  ;;  %p794_p6 = scmp.ne.s32.totalorder %s201_s8, %s793_s13  ;;  %s211_s11 = int_to_ptr.vmem [resolvable:$true] %s210_s11 }
  0x19   : > { %s1222_s9 = scalar_select %p1065_p1, 1, 0 }
  0x1a   : > { %p1071_p2 = pnand %p695_p0, %p1208_p3  ;;  %p801_p11 = scmp.lt.s32.totalorder %s201_s8, %s201_s8 }
  0x1b   : > { %p802_p13 = scmp.lt.s32.totalorder %s793_s13, %s793_s13 }
  0x1c   : > { %p784_p4 = pneg %p1071_p2 }
  0x1d   : > { %p803_p9 = por %p802_p13, %p801_p11 }
  0x1e   : > { %p796_p5 = pnand %p794_p6, %p784_p4 }
  0x20   : > { %p797_p10 = pneg %p796_p5 }
  0x22   : > { %p804_p8 = pnand %p803_p9, %p797_p10 }
  0x24   : > { %807 = shalt.err (!%p804_p8)
}
  0x25   : > { %s1224_s0 = sld [smem:[#allocation16_spill]]  ;;  %s819_s16 = scalar_lea.vmem %s211_s11, 256 }
  0x26   : > { %p820_p0 = scmp.ne.s32.totalorder %s211_s11, %s819_s16  ;;  %p827_p6 = scmp.lt.s32.totalorder %s211_s11, %s211_s11 }
  0x27   : > { %p828_p5 = scmp.lt.s32.totalorder %s819_s16, %s819_s16 }
  0x28   : > { %p822_p3 = pnand %p820_p0, %p784_p4 }
  0x29   : > { %p829_p12 = por %p828_p5, %p827_p6 }
  0x2a   : > { %p823_p7 = pneg %p822_p3 }
  0x2b   : > { %698 = dma.hbm_to_vmem [thread:$0]  (!%p1071_p2), %s1224_s0, 128, %s201_s8, [#allocation4]  }
  0x2c   : > { %p830_p1 = pnand %p829_p12, %p823_p7 }
  0x2e   : > { %833 = shalt.err (!%p830_p1)
}
  0x2f   : > { %s954_s17 = smov 128   ;;  %s955_s25 = smov 8  }
  0x30   : > { %701 = dma.hbm_to_vmem [thread:$0]  (!%p1071_p2), %s1202_s1, 256, %s211_s11, [#allocation7], %s954_s17, %s954_s17, %s955_s25  }
  0x31   : > { %s227_s8 = sand.u32 1, %s950_s23   ;;  %s29_s10 = sadd.s32 1, %s946_s22 }
  0x32   : > { %s229_s13 = sand.u32 1, %s938_s20   ;;  %p30_p3 = scmp.ge.s32.totalorder %s29_s10, 3 }
  0x33   : > { %s652_s14 = sshll.u32 %s229_s13, 6  ;;  %s672_s15 = sshll.u32 %s946_s22, 10 }
  0x34   : > { %s1243_s10 = smov (%p30_p3, %s29_s10), 0  ;;  %s237_s0 = scalar_lea.hbm %s1204_s3, %s672_s15 }
  0x35   : > { %s231_s30 = scalar_lea.vmem [#allocation8], %s652_s14  ;;  %s104_s18 = ssub.s32 %s946_s22, %s1243_s10 }
  0x36   : > { %s238_s12 = sshll.u32 %s231_s30, 4  ;;  %p105_p7 = scmp.eq.s32.totalorder %s104_s18, 0  ;;  %s239_s12 = int_to_ptr.vmem [resolvable:$true] %s238_s12 }
  0x37   : > { %s1225_s11 = sadd.s32 1, %s938_s20  ;;  %s228_s25 = scalar_lea.sflag [#allocation4], %s227_s8 }
  0x38   : > { %s1107_s17 = scalar_select %p105_p7, %s938_s20, %s1225_s11  }
  0x39   : > { %p1226_p8 = scmp.ne.s32.totalorder %s1222_s9, 0  ;;  %s847_s27 = scalar_lea.vmem %s239_s12, 1024 }
  0x3a   : > { %p848_p12 = scmp.ne.s32.totalorder %s239_s12, %s847_s27  ;;  %s956_s7 = smov [#allocation8]  }
  0x3b   : > { %p836_p9 = pneg %p1226_p8  ;;  %s852_s13 = sshll.u32 %s956_s7, 4  ;;  %s853_s13 = int_to_ptr.vmem [resolvable:$false] %s852_s13 }
  0x3c   : > { %s854_s26 = scalar_lea.vmem %s853_s13, 2048  ;;  %p855_p4 = scmp.lt.s32.totalorder %s239_s12, %s853_s13 }
  0x3d   : > { %p850_p1 = pnand %p848_p12, %p836_p9  ;;  %p856_p10 = scmp.lt.s32.totalorder %s854_s26, %s847_s27 }
  0x3f   : > { %p851_p2 = pneg %p850_p1  ;;  %p857_p11 = por %p856_p10, %p855_p4 }
  0x41   : > { %p858_p13 = pnand %p857_p11, %p851_p2 }
  0x43   : > { %861 = shalt.err (!%p858_p13)
}
  0x44   : > { %s957_s18 = smov 256   ;;  %s958_s30 = smov 16  }
  0x45   : > { %705 = dma.hbm_to_vmem [thread:$0]  (!%p1226_p8), %s237_s0, 1024, %s239_s12, %s228_s25, %s957_s18, %s957_s18, %s958_s30  }
  0x46   : > { %p1227_p0 = scmp.ne.s32.totalorder %s1221_s6, 0 }
  0x47   : > { %p1228_p6 = scmp.eq.s32.totalorder (!%p1227_p0), %s1025_s24, 0 }
  0x48   : > { %257 = sbr.rel (%p1227_p0) target bundleno = 710 (0x2c6), region = 40 }
  0x4d   : > { %913 = dma.done.wait (%p1228_p6), [#allocation4], 128   ;;  %p1229_p5 = pmov %p1228_p6 }
  0x4f   : > { %915 = vsyncadd (%p1229_p5), [#allocation4], 4294967168  ;;  %p1230_p3 = pmov %p1229_p5 }
  0x51   : > { %917 = dma.done.wait (%p1230_p3), [#allocation7], 256   ;;  %p1231_p7 = pmov %p1230_p3 }
  0x52   : > { %s267_s9 = sand.u32 1, %s1025_s24   ;;  %s1125_s0 = sand.u32 1, %s934_s19  }
  0x53   : > { %919 = vsyncadd (%p1231_p7), [#allocation7], 4294967040  ;;  %s658_s6 = sshll.u32 %s1125_s0, 6  ;;  %s268_s8 = scalar_lea.sflag [#allocation4], %s267_s9 }
  0x54   : > { %s1128_s14 = scalar_lea.vmem [#allocation8], %s658_s6  ;;  %p1232_p8 = scmp.ne.s32.totalorder %s1217_s28, 0 }
  0x56   : > { %921 = dma.done.wait (%p1232_p8), %s268_s8, 1024  }
  0x57   : > { %923 = vsyncadd (%p1232_p8), %s268_s8, 4294966272  ;;  %s659_s15 = sshll.u32 %s1125_s0, 3  ;;  %p302_p9 = scmp.lt.s32.totalorder %s942_s21, 2 }
  0x58   : > { %s1142_s27 = scalar_lea.vmem [#allocation9], %s659_s15  ;;  %p661_p12 = scmp.ne.s32.totalorder %s942_s21, 0 }
  0x59   : > { %s303_s16 = scalar_select %p302_p9, %s942_s21, 2 }
  0x5a   : > { %309 = sbr.rel (%p661_p12) target bundleno = 328 (0x148), region = 56 }
  0x5b   : > { %s660_s12 = sshll.u32 %s303_s16, 1 }
  0x5c   : > { %s1140_s25 = scalar_lea.vmem %s1205_s4, %s660_s12 }
  0x5f   : > { %v312_v0 = vld [vmem:[#allocation6 + $0x8] sm:$0xff]  ;;  %v959_v1 = vmov 0.0   ;;  %v311_v2 = vld [vmem:[#allocation6] sm:$0xff]  ;;  %vm960_vm0 = vmmov 0   ;;  %v310_v3 = vld [vmem:[#allocation3] sm:$0xff]  ;;  %vm320_vm1 = vcmask 130048  }
  0x60   : > { %676 = vmatprep.subr.mxu0 %v959_v1  ;;  %680 = vmatprep.mubr.msk.f32.mxu0 %vm960_vm0, %v959_v1  ;;  %v662_v4 = vld [vmem:[%s1203_s2] ss:$0 sm:$0xff]  ;;  %vm400_vm2 = vcmask 261120  }
  0x61   : > { %677 = vmatpush3.msra.mxu0 %v312_v0 }
  0x62   : > { %678 = vmatprep.subr.mxu0 %v959_v1 }
  0x63   : > { %679 = vmatpush3.msra.mxu0 %v311_v2 }
  0x64   : > { %681 = vmatmul.mubr.msk.f32.vlgmr.msra.gmra.mxu0 %vm320_vm1, %v310_v3 }
 0x124   : > { %v390_v5 = vpop.f32.mrf.mxu0 }
 0x125   : > { %v391_v6 = vadd.f32 %v662_v4, %v390_v5 }
 0x126   : > { %v682_v7 = vpop.f32.mrf.mxu0 }
 0x127   : > { %v664_v8 = vmul.f32 -1.442695, %v391_v6 }
 0x129   : > { %774 = vpow2.f32 %v664_v8 }
 0x136   : > { %v775_v9 = vpop.eup %774 }
 0x137   : > { %v397_v10 = vadd.f32 1.0, %v775_v9 }
 0x139   : > { %776 = vrcp.f32 %v397_v10 }
 0x146   : > { %v777_v11 = vpop.eup %776 }
 0x147   : > { %401 = vst.msk [vmem:[#allocation2] sm:$0xff] %vm400_vm2, %v777_v11 }
 0x148 PF: > { %v410_v12 = vld [vmem:[%s1128_s14 + $0x38] sm:$0xff]  ;;  %v409_v13 = vld [vmem:[%s1128_s14 + $0x30] sm:$0xff]  ;;  %v408_v14 = vld [vmem:[%s1128_s14 + $0x28] sm:$0xff]  ;;  %v961_v16 = vmov 0.0   ;;  %vm423_vm3 = vcmask 261120   ;;  %v413_v22 = vlaneseq  ;;  %s962_s13 = smov 96  }
 0x149   : > { %451 = vmatprep.subr.mxu0 %v410_v12  ;;  %v407_v15 = vld [vmem:[%s1128_s14 + $0x20] sm:$0xff]  ;;  %491 = vmatprep.mubr.f32.mxu0 %v961_v16  ;;  %v406_v17 = vld [vmem:[%s1128_s14 + $0x18] sm:$0xff]  ;;  %v405_v18 = vld [vmem:[%s1128_s14 + $0x10] sm:$0xff]  ;;  %vm504_vm4 = vcmask 785408   ;;  %p666_p1 = scmp.ge.s32.totalorder %s942_s21, 2 }
 0x14a   : > { %452 = vmatpush1.msra.mxu0 %v409_v13  ;;  %v404_v19 = vld [vmem:[%s1128_s14 + $0x8] sm:$0xff]  ;;  %v403_v20 = vld [vmem:[%s1128_s14] sm:$0xff]  ;;  %v414_v23 = vshrl.u32 %v413_v22, 7 }
 0x14b   : > { %453 = vmatprep.subr.mxu0 %v408_v14  ;;  %v411_v25 = vld [vmem:[%s1140_s25] sm:$0x3] }
 0x14c   : > { %454 = vmatpush1.msra.mxu0 %v407_v15  ;;  %v415_v24 = vsub.s32 0, %v414_v23  ;;  %v419_v27 = vsub.s32 1, %v414_v23 }
 0x14d   : > { %455 = vmatprep.subr.mxu0 %v406_v17 }
 0x14e   : > { %456 = vmatpush1.msra.mxu0 %v405_v18  ;;  %v402_v21 = vld [vmem:[#allocation2] sm:$0xff]  ;;  %v416_v26 = vrot.slane %v411_v25, %v415_v24  ;;  %v420_v30 = vrot.slane %v411_v25, %v419_v27 }
 0x14f   : > { %457 = vmatprep.subr.mxu0 %v404_v19 }
 0x150   : > { %458 = vmatpush1.msra.mxu0 %v403_v20 }
 0x151   : > { %665 = vmatmul.mubr.msk.f32.vlgmr.msra.gmra.mxu0 %vm423_vm3, %v402_v21 }
 0x211   : > { %v493_v28 = vpop.f32.mrf.mxu0 }
 0x212   : > { %v494_v29 = vadd.f32 %v493_v28, %v416_v26 }
 0x213   : > { %v495_v31 = vpop.f32.mrf.mxu0 }
 0x214   : > { %500 = vrot.lane.b32.xlu0 %v494_v29, %s962_s13  ;;  %v496_v32 = vadd.f32 %v495_v31, %v420_v30 }
 0x218   : > { %502 = vrot.lane.b32.xlu0 %v496_v32, %s962_s13 }
 0x286   : > { %v501_v33 = vpop.permute.xlu0 %500 }
 0x288   : > { %511 = sbr.rel (%p666_p1) target bundleno = 686 (0x2ae), region = 60 }
 0x28a   : > { %v503_v34 = vpop.permute.xlu0 %502 }
 0x28b   : > { %v505_v35 = vsel %vm504_vm4, %v501_v33, %v503_v34 }
 0x28c   : > { %507 = vst [vmem:[%s1142_s27] sm:$0xff] %v505_v35 }
 0x28d   : > { %v667_v36 = vmul.f32 -1.442695, %v494_v29 }
 0x28f   : > { %778 = vpow2.f32 %v667_v36 }
 0x29c   : > { %v779_v37 = vpop.eup %778 }
 0x29d   : > { %v515_v38 = vadd.f32 1.0, %v779_v37 }
 0x29f   : > { %780 = vrcp.f32 %v515_v38 }
 0x2ac   : > { %v781_v39 = vpop.eup %780 }
 0x2ad   : > { %518 = vst.msk [vmem:[#allocation2] sm:$0xff] %vm423_vm3, %v781_v39 }
 0x2ae PF: > { %s669_s26 = sshll.u32 %s942_s21, 7  ;;  %s534_s6 = sshll.u32 %s1142_s27, 4  ;;  %s535_s6 = int_to_ptr.vmem [resolvable:$true] %s534_s6 }
 0x2af   : > { %s532_s9 = scalar_lea.hbm %s1206_s5, %s669_s26  ;;  %s520_s8 = scalar_lea.sflag [#allocation5], %s1125_s0 }
 0x2b0   : > { %s862_s14 = scalar_lea.vmem %s535_s6, 128  ;;  %p1233_p4 = scmp.ne.s32.totalorder %s1218_s29, 0 }
 0x2b1   : > { %p863_p2 = scmp.ne.s32.totalorder %s535_s6, %s862_s14  ;;  %s963_s15 = smov [#allocation9]  }
 0x2b2   : > { %s866_s16 = sshll.u32 %s963_s15, 4  ;;  %s867_s16 = int_to_ptr.vmem [resolvable:$false] %s866_s16 }
 0x2b3   : > { %p864_p10 = pnand %p863_p2, %p1233_p4  ;;  %s868_s12 = scalar_lea.vmem %s867_s16, 256 }
 0x2b4   : > { %p869_p13 = scmp.lt.s32.totalorder %s535_s6, %s867_s16  ;;  %p870_p0 = scmp.lt.s32.totalorder %s868_s12, %s862_s14 }
 0x2b5   : > { %p865_p11 = pneg %p864_p10 }
 0x2b6   : > { %p871_p6 = por %p870_p0, %p869_p13 }
 0x2b8   : > { %p872_p5 = pnand %p871_p6, %p865_p11 }
 0x2ba   : > { %875 = shalt.err (!%p872_p5)
}
 0x2bb   : > { %s876_s21 = scalar_lea.hbm %s532_s9, 128  ;;  %s880_s11 = scalar_lea.hbm %s1206_s5, 384 }
 0x2bc   : > { %p877_p3 = scmp.ne.s32.totalorder %s532_s9, %s876_s21  ;;  %p881_p9 = scmp.lt.s32.totalorder %s532_s9, %s1206_s5 }
 0x2bd   : > { %p882_p12 = scmp.lt.s32.totalorder %s880_s11, %s876_s21 }
 0x2be   : > { %p878_p7 = pnand %p877_p3, %p1233_p4 }
 0x2bf   : > { %p883_p1 = por %p882_p12, %p881_p9 }
 0x2c0   : > { %p879_p8 = pneg %p878_p7 }
 0x2c2   : > { %p884_p2 = pnand %p883_p1, %p879_p8 }
 0x2c4   : > { %887 = shalt.err (!%p884_p2)
}
 0x2c5   : > { %693 = dma.vmem_to_hbm [thread:$0]  (%p1233_p4), %s535_s6, 128, %s532_s9, %s520_s8  }
 0x2c6 PF: > { %s1234_s28 = sld [smem:[#allocation14_spill]]  ;;  %p715_p10 = scmp.ge.s32.totalorder %s950_s23, 2 }
 0x2c7   : > { %s1235_s7 = sld [smem:[#allocation15_spill]] }
 0x2cc   : > { %s546_s13 = sand.u32 1, %s1234_s28  }
 0x2cd   : > { %p1236_p11 = scmp.ne.s32.totalorder %s1235_s7, 0  ;;  %s547_s26 = scalar_lea.sflag [#allocation5], %s546_s13 }
 0x2cf   : > { %p707_p13 = pnand %p715_p10, %p1236_p11 }
 0x2d1   : > { %p708_p0 = pneg %p707_p13 }
 0x2d3   : > { %925 = dma.done.wait (%p708_p0), %s547_s26, 128  }
 0x2d4   : > { %927 = vsyncadd (%p708_p0), %s547_s26, 4294967168  ;;  %s20_s23 = sadd.s32 1, %s950_s23   ;;  %s1237_s18 = smov %s934_s19 }
 0x2d5   : > { %p17_p6 = scmp.ge.s32.totalorder %s20_s23, 5   ;;  %s1238_s19 = smov %s938_s20 }
 0x2d6   : > { %s1239_s20 = smov %s1107_s17  ;;  %s1240_s21 = smov %s946_s22 }
 0x2d7   : > { %s1241_s22 = smov %s1243_s10  ;;  %19 = sbr.rel (!%p17_p6) target bundleno = 8 (0x8), region = 104 }
 0x2dc   :  { %552 = vsyncpa [#allocation4], 1 }
 0x2dd   :  { %554 = vsyncpa [#allocation4 + $0x1], 1 }
 0x2de   :  { %555 = vsyncpa [#allocation7], 1 }
 0x2df   :  { %556 = vsyncpa [#allocation5], 1 }
 0x2e0   :  { %558 = vsyncpa [#allocation5 + $0x1], 1 }

</bundles_post_ra>
